<compile_context>
chip_gen: v7x
topology: tpu7x:2x2x1
jax: 0.10.0
libtpu: 0.0.40
codegen_flags: <defaults>
</compile_context>

<pallas_src>
import functools

import jax
import jax.numpy as jnp
from jax.experimental import pallas as pl
from jax.experimental.pallas import tpu as pltpu

LN_EPS = 1e-5  # torch.nn.LayerNorm default
_INV_SQRT2 = 0.7071067811865475


def _round_up(v, m):
    return (v + m - 1) // m * m


def _cdiv(a, b):
    return -(-a // b)


def _tpu_generation_info():
    """(vmem_capacity_bytes, is_v5_class) -- best effort; conservative (v7x-safe) fallback."""
    cap = 64 * 1024 * 1024
    is_v5 = False
    try:
        info = pltpu.get_tpu_info()
        cap = int(getattr(info, "vmem_capacity_bytes", cap))
        ver = str(getattr(info, "chip_version", "")).lower()
        is_v5 = "5" in ver  # v5e/v5p: 128-wide MXU, no bf16 VPU/EUP
    except Exception:
        pass
    cap = min(max(cap, 64 * 1024 * 1024), 256 * 1024 * 1024)
    return cap, is_v5


def _pad_feature(d, mxu_align):
    # 128 lanes is the hard requirement; pad up to the MXU width (256 on v6e/v7x) once the
    # dim is big enough that a ragged trailing 128-slab would half-fill a 256x256 MXU pass.
    if d <= 128 or mxu_align == 128:
        return _round_up(d, 128)
    return _round_up(d, mxu_align)


# ----------------------------- kernel helpers -----------------------------


def _ln_affine(x_raw, g, c, dim_real):
    """LayerNorm over the real feature count (lane padding masked) + folded (LN affine+SSF0)."""
    x = x_raw.astype(jnp.float32)
    inv_d = jnp.float32(1.0 / dim_real)
    if x.shape[-1] != dim_real:
        col = jax.lax.broadcasted_iota(jnp.int32, x.shape, dimension=1)
        valid = col < dim_real
        x = jnp.where(valid, x, 0.0)
        mean = jnp.sum(x, axis=-1, keepdims=True) * inv_d
        cent = jnp.where(valid, x - mean, 0.0)
    else:
        mean = jnp.sum(x, axis=-1, keepdims=True) * inv_d
        cent = x - mean
    var = jnp.sum(cent * cent, axis=-1, keepdims=True) * inv_d
    xn = cent * jax.lax.rsqrt(var + LN_EPS)
    return xn * g + c


def _gelu(h, approx):
    if approx:
        # tanh-approx GELU -> EUP tanh slot (frees the VALU next to the fast v6e/v7x MXUs)
        return jax.nn.gelu(h, approximate=True)
    # exact erf (bit-faithful to torch.nn.GELU default) -- used on v5e where it is free
    return 0.5 * h * (1.0 + jax.lax.erf(h * _INV_SQRT2))


# ----------------------------- kernels -----------------------------


def _ffn_kernel_resident(x_ref, vd_ref, b1_ref, w1_ref, w2_ref, o_ref, *,
                         dim_real, approx_gelu):
    """Whole W1/W2 resident in VMEM (single copy); one row tile per grid step."""
    xn = _ln_affine(x_ref[...], vd_ref[0:1, :], vd_ref[1:2, :], dim_real)
    h = jnp.dot(xn.astype(jnp.bfloat16), w1_ref[...],
                preferred_element_type=jnp.float32) + b1_ref[...]
    h = _gelu(h, approx_gelu)
    y = jnp.dot(h.astype(jnp.bfloat16), w2_ref[...],
                preferred_element_type=jnp.float32) + vd_ref[2:3, :]
    o_ref[...] = y.astype(o_ref.dtype)


def _ffn_kernel_hidden_split(x_ref, vd_ref, b1_ref, w1_ref, w2_ref, o_ref,
                             xn_ref, acc_ref, *, dim_real, approx_gelu):
    """Hidden dim streamed in blocks (last grid axis, 'arbitrary'); f32 VMEM accumulator."""
    j = pl.program_id(1)

    @pl.when(j == 0)
    def _():
        xn = _ln_affine(x_ref[...], vd_ref[0:1, :], vd_ref[1:2, :], dim_real)
        xn_ref[...] = xn.astype(jnp.bfloat16)
        acc_ref[...] = jnp.zeros_like(acc_ref)

    h = jnp.dot(xn_ref[...], w1_ref[...],
                preferred_element_type=jnp.float32) + b1_ref[...]
    h = _gelu(h, approx_gelu)
    acc_ref[...] += jnp.dot(h.astype(jnp.bfloat16), w2_ref[...],
                            preferred_element_type=jnp.float32)

    @pl.when(j == pl.num_programs(1) - 1)
    def _():
        o_ref[...] = (acc_ref[...] + vd_ref[2:3, :]).astype(o_ref.dtype)


# ----------------------------- wrapper -----------------------------


def feedforward_pallas(x, params, *, block_rows=None, hidden_block=None, approx_gelu=None):
    """x: (B, N, dim) float32. params: dict of weights (see init_params)."""
    B, N, dim = x.shape
    hidden = params["w1"].shape[1]
    rows = B * N

    vmem_cap, is_v5 = _tpu_generation_info()
    budget = int(vmem_cap * 0.85)           # headroom for Mosaic scratch / activation spill
    mxu_align = 128 if is_v5 else 256
    if approx_gelu is None:
        approx_gelu = not is_v5             # EUP tanh on v6e/v7x; exact erf on v5e

    # ---- one-time host-side affine folding ----
    f32 = jnp.float32
    g = (params["ln_w"] * params["ssf_scale_0"]).astype(f32)
    c = (params["ln_b"] * params["ssf_scale_0"] + params["ssf_shift_0"]).astype(f32)
    w1f = (params["w1"] * params["ssf_scale_1"][None, :]).astype(jnp.bfloat16)
    b1f = (params["b1"] * params["ssf_scale_1"] + params["ssf_shift_1"]).astype(f32)
    w2f = (params["w2"] * params["ssf_scale_2"][None, :]).astype(jnp.bfloat16)
    b2f = (params["b2"] * params["ssf_scale_2"] + params["ssf_shift_2"]).astype(f32)

    # ---- MXU/lane aligned padded feature dims ----
    dim_p = _pad_feature(dim, mxu_align)
    hid_p = _pad_feature(hidden, mxu_align)

    # ---- row tiling (bigger tiles on 128 MiB parts); guarantee >=2 steps for v7x megacore ----
    if block_rows is None:
        block_rows = 512 if vmem_cap > 96 * 1024 * 1024 else 256
    block_rows = max(8, _round_up(min(block_rows, _round_up(rows, 8)), 8))
    if rows > 8 and _cdiv(rows, block_rows) < 2:
        block_rows = _round_up(_cdiv(rows, 2), 8)

    # ---- VMEM estimates and mode selection ----
    def mode_a_bytes(br):
        return (4 * br * dim_p * 4                    # x in + y out, double-buffered, f32
                + 2 * dim_p * hid_p * 2               # W1 + W2 resident (single copy, bf16)
                + 8 * (dim_p + hid_p) * 4             # folded vectors (sublane padded)
                + 2 * br * hid_p * 4)                 # hidden activation (vregs + spill)

    def mode_b_bytes(br, hb):
        return (4 * br * dim_p * 4                    # x in + y out, double-buffered, f32
                + 2 * 2 * dim_p * hb * 2              # W1/W2 blocks, double-buffered, bf16
                + 8 * dim_p * 4 + 2 * 8 * hb * 4      # vectors + b1 blocks
                + br * dim_p * (2 + 4)                # xn (bf16) + acc (f32) scratch
                + 2 * br * hb * 4)                    # hidden activation slab

    use_split = False
    hid_blk = hid_p
    if hidden_block is not None:
        use_split = True
        hid_blk = min(_round_up(hidden_block, 128), hid_p)
    elif mode_a_bytes(block_rows) > budget:
        use_split = True
        n = 2
        hid_blk = _round_up(_cdiv(hid_p, n), mxu_align)
        while mode_b_bytes(block_rows, hid_blk) > budget and hid_blk > mxu_align:
            n += 1
            hid_blk = _round_up(_cdiv(hid_p, n), mxu_align)
        while mode_b_bytes(block_rows, hid_blk) > budget and block_rows > 64:
            block_rows = _round_up(max(8, block_rows // 2), 8)

    if use_split:
        hid_blocks = _cdiv(hid_p, hid_blk)
        hid_p = hid_blk * hid_blocks              # re-pad so hidden blocks tile evenly
    else:
        hid_blocks = 1

    rows_p = _round_up(rows, block_rows)
    vmem_limit = int(max(budget, 32 * 1024 * 1024))

    # ---- padded operands ----
    x2d = x.reshape(rows, dim)
    x2d = jnp.pad(x2d, ((0, rows_p - rows), (0, dim_p - dim)))

    vd = jnp.zeros((3, dim_p), f32)               # rows: folded g, folded c, folded b2
    vd = vd.at[0, :dim].set(g).at[1, :dim].set(c).at[2, :dim].set(b2f)
    b1_p = jnp.zeros((1, hid_p), f32).at[0, :hidden].set(b1f)
    w1_p = jnp.pad(w1f, ((0, dim_p - dim), (0, hid_p - hidden)))
    w2_p = jnp.pad(w2f, ((0, hid_p - hidden), (0, dim_p - dim)))

    vmem_whole = pl.BlockSpec(memory_space=pltpu.MemorySpace.VMEM)  # resident, single copy

    if not use_split:
        out = pl.pallas_call(
            functools.partial(_ffn_kernel_resident, dim_real=dim, approx_gelu=approx_gelu),
            out_shape=jax.ShapeDtypeStruct((rows_p, dim_p), x.dtype),
            grid_spec=pltpu.PrefetchScalarGridSpec(
                num_scalar_prefetch=0,
                grid=(rows_p // block_rows,),
                in_specs=[
                    pl.BlockSpec((block_rows, dim_p), lambda i: (i, 0)),  # x row tile
                    vmem_whole,                                           # packed g/c/b2
                    vmem_whole,                                           # b1 (folded)
                    vmem_whole,                                           # W1 (bf16, SSF1 folded)
                    vmem_whole,                                           # W2 (bf16, SSF2 folded)
                ],
                out_specs=pl.BlockSpec((block_rows, dim_p), lambda i: (i, 0)),
            ),
            compiler_params=pltpu.CompilerParams(
                dimension_semantics=("parallel",),
                vmem_limit_bytes=vmem_limit,
            ),
        )(x2d, vd, b1_p, w1_p, w2_p)
    else:
        out = pl.pallas_call(
            functools.partial(_ffn_kernel_hidden_split, dim_real=dim, approx_gelu=approx_gelu),
            out_shape=jax.ShapeDtypeStruct((rows_p, dim_p), x.dtype),
            grid_spec=pltpu.PrefetchScalarGridSpec(
                num_scalar_prefetch=0,
                grid=(rows_p // block_rows, hid_blocks),
                in_specs=[
                    pl.BlockSpec((block_rows, dim_p), lambda i, j: (i, 0)),  # x (resident across j)
                    vmem_whole,                                              # packed g/c/b2
                    pl.BlockSpec((1, hid_blk), lambda i, j: (0, j)),         # b1 block
                    pl.BlockSpec((dim_p, hid_blk), lambda i, j: (0, j)),     # W1 column block
                    pl.BlockSpec((hid_blk, dim_p), lambda i, j: (j, 0)),     # W2 row block
                ],
                out_specs=pl.BlockSpec((block_rows, dim_p), lambda i, j: (i, 0)),
                scratch_shapes=[
                    pltpu.VMEM((block_rows, dim_p), jnp.bfloat16),  # LN+affine result, reused over j
                    pltpu.VMEM((block_rows, dim_p), jnp.float32),   # output accumulator
                ],
            ),
            compiler_params=pltpu.CompilerParams(
                dimension_semantics=("parallel", "arbitrary"),
                vmem_limit_bytes=vmem_limit,
            ),
        )(x2d, vd, b1_p, w1_p, w2_p)

    return out[:rows, :dim].reshape(B, N, dim)


# ----------------------------- params / reference -----------------------------


def init_params(key, dim, hidden_dim):
    """Deterministic init mirroring the PyTorch module's parameter shapes."""
    ks = jax.random.split(key, 10)
    ssf_scale_0 = 1.0 + 0.02 * jax.random.normal(ks[0], (dim,), jnp.float32)
    ssf_shift_0 = 0.02 * jax.random.normal(ks[1], (dim,), jnp.float32)
    ssf_scale_1 = 1.0 + 0.02 * jax.random.normal(ks[2], (hidden_dim,), jnp.float32)
    ssf_shift_1 = 0.02 * jax.random.normal(ks[3], (hidden_dim,), jnp.float32)
    ssf_scale_2 = 1.0 + 0.02 * jax.random.normal(ks[4], (dim,), jnp.float32)
    ssf_shift_2 = 0.02 * jax.random.normal(ks[5], (dim,), jnp.float32)
    ln_w = jnp.ones((dim,), jnp.float32)
    ln_b = jnp.zeros((dim,), jnp.float32)
    lim1 = 1.0 / jnp.sqrt(dim)
    w1 = jax.random.uniform(ks[6], (dim, hidden_dim), jnp.float32, -lim1, lim1)
    b1 = jax.random.uniform(ks[7], (hidden_dim,), jnp.float32, -lim1, lim1)
    lim2 = 1.0 / jnp.sqrt(hidden_dim)
    w2 = jax.random.uniform(ks[8], (hidden_dim, dim), jnp.float32, -lim2, lim2)
    b2 = jax.random.uniform(ks[9], (dim,), jnp.float32, -lim2, lim2)
    return dict(
        ssf_scale_0=ssf_scale_0, ssf_shift_0=ssf_shift_0,
        ssf_scale_1=ssf_scale_1, ssf_shift_1=ssf_shift_1,
        ssf_scale_2=ssf_scale_2, ssf_shift_2=ssf_shift_2,
        ln_w=ln_w, ln_b=ln_b, w1=w1, b1=b1, w2=w2, b2=b2,
    )


def feedforward_ref(x, p):
    """Pure-JAX f32 reference of the PyTorch forward (dropout p=0, exact-erf GELU)."""
    mean = jnp.mean(x, axis=-1, keepdims=True)
    var = jnp.mean((x - mean) ** 2, axis=-1, keepdims=True)
    xn = (x - mean) / jnp.sqrt(var + LN_EPS) * p["ln_w"] + p["ln_b"]
    xn = xn * p["ssf_scale_0"] + p["ssf_shift_0"]
    h = xn @ p["w1"] + p["b1"]
    h = h * p["ssf_scale_1"] + p["ssf_shift_1"]
    h = 0.5 * h * (1.0 + jax.lax.erf(h / jnp.sqrt(2.0)))
    y = h @ p["w2"] + p["b2"]
    y = y * p["ssf_scale_2"] + p["ssf_shift_2"]
    return y


if __name__ == "__main__":
    key = jax.random.PRNGKey(0)

    # --- test 1: small shapes, resident-weight path (Mode A), multi-step row grid ---
    B, N, dim, hidden = 2, 8, 32, 64
    kx, kp, kx2, kp2 = jax.random.split(key, 4)
    x = jax.random.normal(kx, (B, N, dim), jnp.float32)
    params = init_params(kp, dim, hidden)
    out = jax.block_until_ready(feedforward_pallas(x, params))
    ref = feedforward_ref(x, params)
    assert out.shape == (B, N, dim)
    assert jnp.allclose(out, ref, atol=5e-2, rtol=5e-2), "mismatch vs reference (resident path)"

    # --- test 2: forced hidden-split path (Mode B) with 2 hidden blocks + accumulator ---
    B2, N2, dim2, hidden2 = 2, 16, 128, 512
    x2 = jax.random.normal(kx2, (B2, N2, dim2), jnp.float32)
    params2 = init_params(kp2, dim2, hidden2)
    out2 = jax.block_until_ready(feedforward_pallas(x2, params2, hidden_block=256))
    ref2 = feedforward_ref(x2, params2)
    assert out2.shape == (B2, N2, dim2)
    assert jnp.allclose(out2, ref2, atol=5e-2, rtol=5e-2), "mismatch vs reference (split path)"

    print("KERNEL_OK")
</pallas_src>

<mosaic_0001>
module attributes {stable_mosaic.version = 11 : i64} {
  func.func @_ffn_kernel_resident(%arg0: i32, %arg1: memref<8x128xf32, #tpu.memory_space<vmem>>, %arg2: memref<3x128xf32, #tpu.memory_space<vmem>>, %arg3: memref<1x128xf32, #tpu.memory_space<vmem>>, %arg4: memref<128x128xbf16, #tpu.memory_space<vmem>>, %arg5: memref<128x128xbf16, #tpu.memory_space<vmem>>, %arg6: memref<8x128xf32, #tpu.memory_space<vmem>>) attributes {dimension_semantics = [#tpu.dimension_semantics<parallel>], iteration_bounds = array<i64: 2>, scalar_prefetch = 0 : i64, scratch_operands = 0 : i64, tpu.core_type = #tpu.core_type<tc>, window_params = [{transform_indices = @transform_0, window_bounds = array<i64: 8, 128>}, {pipeline_mode = #tpu.pipeline_mode<synchronous>, transform_indices = @transform_1, window_bounds = array<i64: 3, 128>}, {pipeline_mode = #tpu.pipeline_mode<synchronous>, transform_indices = @transform_2, window_bounds = array<i64: 1, 128>}, {pipeline_mode = #tpu.pipeline_mode<synchronous>, transform_indices = @transform_3, window_bounds = array<i64: 128, 128>}, {pipeline_mode = #tpu.pipeline_mode<synchronous>, transform_indices = @transform_4, window_bounds = array<i64: 128, 128>}, {transform_indices = @transform_5, window_bounds = array<i64: 8, 128>}]} {
    %c0 = arith.constant 0 : index
    %c0_0 = arith.constant 0 : index
    %0 = vector.load %arg1[%c0, %c0_0] : memref<8x128xf32, #tpu.memory_space<vmem>>, vector<8x128xf32>
    %c0_1 = arith.constant 0 : index
    %c0_2 = arith.constant 0 : index
    %1 = vector.load %arg2[%c0_1, %c0_2] : memref<3x128xf32, #tpu.memory_space<vmem>>, vector<1x128xf32>
    %c1 = arith.constant 1 : index
    %c0_3 = arith.constant 0 : index
    %2 = vector.load %arg2[%c1, %c0_3] : memref<3x128xf32, #tpu.memory_space<vmem>>, vector<1x128xf32>
    %3 = tpu.iota {dimensions = array<i32: 1>} : vector<8x128xi32>
    %c32_i32 = arith.constant 32 : i32
    %4 = vector.broadcast %c32_i32 : i32 to vector<8x128xi32>
    %5 = arith.cmpi slt, %3, %4 : vector<8x128xi32>
    %cst = arith.constant 0.000000e+00 : f32
    %6 = vector.broadcast %cst : f32 to vector<8x128xf32>
    %7 = arith.select %5, %0, %6 : vector<8x128xi1>, vector<8x128xf32>
    %cst_4 = arith.constant dense<0.000000e+00> : vector<8xf32>
    %8 = vector.multi_reduction <add>, %7, %cst_4 [1] : vector<8x128xf32> to vector<8xf32>
    %9 = vector.shape_cast %8 : vector<8xf32> to vector<8x1xf32>
    %cst_5 = arith.constant 3.125000e-02 : f32
    %10 = vector.broadcast %cst_5 : f32 to vector<8x1xf32>
    %11 = arith.mulf %9, %10 : vector<8x1xf32>
    %12 = vector.broadcast %11 : vector<8x1xf32> to vector<8x128xf32>
    %13 = arith.subf %7, %12 : vector<8x128xf32>
    %cst_6 = arith.constant 0.000000e+00 : f32
    %14 = vector.broadcast %cst_6 : f32 to vector<8x128xf32>
    %15 = arith.select %5, %13, %14 : vector<8x128xi1>, vector<8x128xf32>
    %16 = arith.mulf %15, %15 : vector<8x128xf32>
    %cst_7 = arith.constant dense<0.000000e+00> : vector<8xf32>
    %17 = vector.multi_reduction <add>, %16, %cst_7 [1] : vector<8x128xf32> to vector<8xf32>
    %18 = vector.shape_cast %17 : vector<8xf32> to vector<8x1xf32>
    %cst_8 = arith.constant 3.125000e-02 : f32
    %19 = vector.broadcast %cst_8 : f32 to vector<8x1xf32>
    %20 = arith.mulf %18, %19 : vector<8x1xf32>
    %cst_9 = arith.constant 9.99999974E-6 : f32
    %21 = vector.broadcast %cst_9 : f32 to vector<8x1xf32>
    %22 = arith.addf %20, %21 : vector<8x1xf32>
    %23 = math.rsqrt %22 : vector<8x1xf32>
    %24 = vector.broadcast %23 : vector<8x1xf32> to vector<8x128xf32>
    %25 = arith.mulf %15, %24 : vector<8x128xf32>
    %26 = vector.broadcast %1 : vector<1x128xf32> to vector<8x128xf32>
    %27 = arith.mulf %25, %26 : vector<8x128xf32>
    %28 = vector.broadcast %2 : vector<1x128xf32> to vector<8x128xf32>
    %29 = arith.addf %27, %28 : vector<8x128xf32>
    %30 = arith.truncf %29 : vector<8x128xf32> to vector<8x128xbf16>
    %c0_10 = arith.constant 0 : index
    %c0_11 = arith.constant 0 : index
    %31 = vector.load %arg4[%c0_10, %c0_11] : memref<128x128xbf16, #tpu.memory_space<vmem>>, vector<128x128xbf16>
    %cst_12 = arith.constant dense<0.000000e+00> : vector<8x128xf32>
    %32 = tpu.matmul %30, %31, %cst_12 {dimension_numbers = #tpu.dot_dimension_numbers<[1], [0], [0], [1], [0, 0, 1, 1], [], []>} : vector<8x128xbf16>, vector<128x128xbf16>, vector<8x128xf32> -> vector<8x128xf32>
    %c0_13 = arith.constant 0 : index
    %c0_14 = arith.constant 0 : index
    %33 = vector.load %arg3[%c0_13, %c0_14] : memref<1x128xf32, #tpu.memory_space<vmem>>, vector<1x128xf32>
    %34 = vector.broadcast %33 : vector<1x128xf32> to vector<8x128xf32>
    %35 = arith.addf %32, %34 : vector<8x128xf32>
    %36 = arith.mulf %35, %35 : vector<8x128xf32>
    %37 = arith.mulf %35, %36 : vector<8x128xf32>
    %cst_15 = arith.constant 4.471500e-02 : f32
    %38 = vector.broadcast %cst_15 : f32 to vector<8x128xf32>
    %39 = arith.mulf %38, %37 : vector<8x128xf32>
    %40 = arith.addf %35, %39 : vector<8x128xf32>
    %cst_16 = arith.constant 0.797884583 : f32
    %41 = vector.broadcast %cst_16 : f32 to vector<8x128xf32>
    %42 = arith.mulf %41, %40 : vector<8x128xf32>
    %43 = math.tanh %42 : vector<8x128xf32>
    %cst_17 = arith.constant 1.000000e+00 : f32
    %44 = vector.broadcast %cst_17 : f32 to vector<8x128xf32>
    %45 = arith.addf %44, %43 : vector<8x128xf32>
    %cst_18 = arith.constant 5.000000e-01 : f32
    %46 = vector.broadcast %cst_18 : f32 to vector<8x128xf32>
    %47 = arith.mulf %46, %45 : vector<8x128xf32>
    %48 = arith.mulf %35, %47 : vector<8x128xf32>
    %49 = arith.truncf %48 : vector<8x128xf32> to vector<8x128xbf16>
    %c0_19 = arith.constant 0 : index
    %c0_20 = arith.constant 0 : index
    %50 = vector.load %arg5[%c0_19, %c0_20] : memref<128x128xbf16, #tpu.memory_space<vmem>>, vector<128x128xbf16>
    %cst_21 = arith.constant dense<0.000000e+00> : vector<8x128xf32>
    %51 = tpu.matmul %49, %50, %cst_21 {dimension_numbers = #tpu.dot_dimension_numbers<[1], [0], [0], [1], [0, 0, 1, 1], [], []>} : vector<8x128xbf16>, vector<128x128xbf16>, vector<8x128xf32> -> vector<8x128xf32>
    %c2 = arith.constant 2 : index
    %c0_22 = arith.constant 0 : index
    %52 = vector.load %arg2[%c2, %c0_22] : memref<3x128xf32, #tpu.memory_space<vmem>>, vector<1x128xf32>
    %53 = vector.broadcast %52 : vector<1x128xf32> to vector<8x128xf32>
    %54 = arith.addf %51, %53 : vector<8x128xf32>
    %c0_23 = arith.constant 0 : index
    %c0_24 = arith.constant 0 : index
    %55 = vector.load %arg6[%c0_23, %c0_24] : memref<8x128xf32, #tpu.memory_space<vmem>>, vector<8x128xf32>
    tpu.vector_store %arg6[%c0_23, %c0_24], %54 {strides = array<i32>} : memref<8x128xf32, #tpu.memory_space<vmem>>, vector<8x128xf32>,
    return
  }
  func.func @transform_0(%arg0: i32) -> (i32, i32) {
    %c0_i32 = arith.constant 0 : i32
    %c0_i32_0 = arith.constant 0 : i32
    return %arg0, %c0_i32 : i32, i32
  }
  func.func @transform_1(%arg0: i32) -> (i32, i32) {
    %c0_i32 = arith.constant 0 : i32
    %c0_i32_0 = arith.constant 0 : i32
    %c0_i32_1 = arith.constant 0 : i32
    return %c0_i32, %c0_i32_0 : i32, i32
  }
  func.func @transform_2(%arg0: i32) -> (i32, i32) {
    %c0_i32 = arith.constant 0 : i32
    %c0_i32_0 = arith.constant 0 : i32
    %c0_i32_1 = arith.constant 0 : i32
    return %c0_i32, %c0_i32_0 : i32, i32
  }
  func.func @transform_3(%arg0: i32) -> (i32, i32) {
    %c0_i32 = arith.constant 0 : i32
    %c0_i32_0 = arith.constant 0 : i32
    %c0_i32_1 = arith.constant 0 : i32
    return %c0_i32, %c0_i32_0 : i32, i32
  }
  func.func @transform_4(%arg0: i32) -> (i32, i32) {
    %c0_i32 = arith.constant 0 : i32
    %c0_i32_0 = arith.constant 0 : i32
    %c0_i32_1 = arith.constant 0 : i32
    return %c0_i32, %c0_i32_0 : i32, i32
  }
  func.func @transform_5(%arg0: i32) -> (i32, i32) {
    %c0_i32 = arith.constant 0 : i32
    %c0_i32_0 = arith.constant 0 : i32
    return %arg0, %c0_i32 : i32, i32
  }
}

</mosaic_0001>

<bundles_post_ra>
// kernel: tpu_custom_call.1
= control target key start
LH: loop header
LB: loop body
LE: loop exit
PB: predicated region body
PF: predicated region fallthrough
CT: control target
= control target key end

     0   :  { %10 = vsyncpa [#allocation3], 0  ;;  %s1357_s0 = inlined_call_operand.hbm [shape: f32[16,128], index: 0, kind: input, shape index: {}]   ;;  %s1358_s1 = inlined_call_operand.hbm [shape: f32[3,128], index: 1, kind: input, shape index: {}]   ;;  %s1359_s2 = inlined_call_operand.vmem [shape: f32[1,128], index: 2, kind: input, shape index: {}]   ;;  %s1360_s3 = inlined_call_operand.hbm [shape: bf16[128,128], index: 3, kind: input, shape index: {}]   ;;  %s1361_s4 = inlined_call_operand.hbm [shape: bf16[128,128], index: 4, kind: input, shape index: {}]   ;;  %s1362_s5 = inlined_call_operand.hbm [shape: f32[16,128], index: 5, kind: output, shape index: {}]  }
   0x1   :  { %12 = vsyncpa [#allocation3 + $0x1], 0 }
   0x2   :  { %13 = vsyncpa [#allocation6], 0 }
   0x3   :  { %14 = vsyncpa [#allocation9], 0 }
   0x4   :  { %15 = vsyncpa [#allocation4], 0 }
   0x5   :  { %17 = vsyncpa [#allocation4 + $0x1], 0  ;;  %s1083_s18 = smov 0   ;;  %s1085_s19 = smov 0  }
   0x6   :  { %s1087_s20 = smov 0   ;;  %s1089_s21 = smov 0  }
   0x7 LB: > { %s1104_s22 = sadd.s32 4294967295, %s1042_s21   ;;  %s657_s23 = sadd.s32 4294967294, %s1042_s21   ;;  %s1042_s21 = sphi %s1089_s21, %s1385_s21   ;;  %s1038_s20 = sphi %s1087_s20, %s1384_s20   ;;  %s1034_s19 = sphi %s1085_s19, %s1383_s19   ;;  %s1030_s18 = sphi %s1083_s18, %s1382_s18  }
   0x8   : > { %p43_p0 = scmp.ne.s32.totalorder %s1034_s19, %s1030_s18  ;;  %p1363_p1 = scmp.eq.s32.totalorder %s1104_s22, 0 }
   0x9   : > { %p157_p3 = scmp.eq.s32.totalorder %s657_s23, 1  ;;  %p658_p5 = scmp.ge.s32.totalorder %s1042_s21, 1 }
   0xa   : > { %p1113_p4 = por %p1363_p1, %p43_p0  ;;  %p164_p7 = scmp.lt.s32.totalorder %s1042_s21, 3 }
   0xb   : > { %p1118_p6 = por %p157_p3, %p43_p0  ;;  %s1044_s27 = smov [#allocation5]  }
   0xc   : > { %s1366_s24 = scalar_select %p1113_p4, 1, 0 }
   0xd   : > { %s1367_s25 = scalar_select %p1118_p6, 1, 0 }
   0xe   : > { %p1123_p8 = pnand %p658_p5, %p164_p7  ;;  %s177_s28 = sshll.u32 %s1044_s27, 4  ;;  %s178_s28 = int_to_ptr.vmem [resolvable:$true] %s177_s28 }
   0xf   : > { %s1045_s29 = smov [#allocation7]   ;;  %s1046_s7 = smov [#allocation8]  }
  0x10   : > { %s1368_s26 = scalar_select %p1123_p8, 1, 0 }
  0x11   : > { %p769_p10 = pneg %p1123_p8  ;;  %s190_s30 = sshll.u32 %s1045_s29, 4  ;;  %s1136_s30 = int_to_ptr.vmem [resolvable:$true] %s190_s30 }
  0x12   : > { %s1138_s8 = sshll.u32 %s1046_s7, 4  ;;  %s854_s11 = scalar_lea.hbm %s1358_s1, 64  ;;  %s204_s8 = int_to_ptr.vmem [resolvable:$true] %s1138_s8 }
  0x13   : > { %p1132_p11 = pnand %p769_p10, %p1363_p1  ;;  %p855_p12 = scmp.ne.s32.totalorder %s1358_s1, %s854_s11 }
  0x14   : > { %p861_p5 = scmp.lt.u32.totalorder %s854_s11, %s1358_s1 }
  0x15   : > { %p1148_p13 = pneg %p1132_p11 }
  0x17   : > { %p857_p0 = pnand %p1148_p13, %p855_p12 }
  0x19   : > { %p858_p3 = pneg %p857_p0 }
  0x1b   : > { %p863_p7 = pnand %p861_p5, %p858_p3 }
  0x1d   : > { %866 = shalt.err (!%p863_p7)
}
  0x1e   : > { %s867_s17 = scalar_lea.vmem %s178_s28, 64  ;;  %p875_p2 = scmp.lt.s32.totalorder %s178_s28, %s178_s28 }
  0x1f   : > { %p868_p10 = scmp.ne.s32.totalorder %s178_s28, %s867_s17  ;;  %p876_p6 = scmp.lt.s32.totalorder %s867_s17, %s867_s17 }
  0x21   : > { %p870_p9 = pnand %p868_p10, %p1148_p13  ;;  %p877_p4 = por %p876_p6, %p875_p2 }
  0x23   : > { %p871_p1 = pneg %p870_p9 }
  0x25   : > { %p878_p8 = pnand %p877_p4, %p871_p1 }
  0x27   : > { %881 = shalt.err (!%p878_p8)
}
  0x28   : > { %772 = dma.hbm_to_vmem [thread:$0]  (!%p1132_p11), %s1358_s1, 64, %s178_s28, [#allocation6]  }
  0x29   : > { %s882_s9 = scalar_lea.hbm %s1360_s3, 1024 }
  0x2a   : > { %p883_p9 = scmp.ne.s32.totalorder %s1360_s3, %s882_s9  ;;  %p889_p1 = scmp.lt.u32.totalorder %s882_s9, %s1360_s3 }
  0x2c   : > { %p885_p12 = pnand %p883_p9, %p1148_p13 }
  0x2e   : > { %p886_p2 = pneg %p885_p12 }
  0x30   : > { %p891_p4 = pnand %p889_p1, %p886_p2 }
  0x32   : > { %894 = shalt.err (!%p891_p4)
}
  0x33   : > { %s895_s28 = scalar_lea.vmem %s1136_s30, 1024  ;;  %p903_p3 = scmp.lt.s32.totalorder %s1136_s30, %s1136_s30 }
  0x34   : > { %p896_p6 = scmp.ne.s32.totalorder %s1136_s30, %s895_s28  ;;  %p904_p5 = scmp.lt.s32.totalorder %s895_s28, %s895_s28 }
  0x36   : > { %p898_p8 = pnand %p896_p6, %p1148_p13  ;;  %p905_p7 = por %p904_p5, %p903_p3 }
  0x38   : > { %p899_p0 = pneg %p898_p8 }
  0x3a   : > { %p906_p10 = pnand %p905_p7, %p899_p0 }
  0x3c   : > { %909 = shalt.err (!%p906_p10)
}
  0x3d   : > { %s1047_s15 = smov 64   ;;  %s1048_s16 = smov 4  }
  0x3e   : > { %775 = dma.hbm_to_vmem [thread:$0]  (!%p1132_p11), %s1360_s3, 1024, %s1136_s30, [#allocation6], %s1047_s15, %s1047_s15, %s1048_s16  }
  0x3f   : > { %s910_s7 = scalar_lea.hbm %s1361_s4, 1024 }
  0x40   : > { %p911_p9 = scmp.ne.s32.totalorder %s1361_s4, %s910_s7  ;;  %p917_p1 = scmp.lt.u32.totalorder %s910_s7, %s1361_s4 }
  0x42   : > { %p913_p12 = pnand %p911_p9, %p1148_p13 }
  0x44   : > { %p914_p2 = pneg %p913_p12 }
  0x46   : > { %p919_p4 = pnand %p917_p1, %p914_p2 }
  0x48   : > { %922 = shalt.err (!%p919_p4)
}
  0x49   : > { %s923_s13 = scalar_lea.vmem %s204_s8, 1024  ;;  %p931_p3 = scmp.lt.s32.totalorder %s204_s8, %s204_s8 }
  0x4a   : > { %p924_p6 = scmp.ne.s32.totalorder %s204_s8, %s923_s13  ;;  %p932_p5 = scmp.lt.s32.totalorder %s923_s13, %s923_s13 }
  0x4c   : > { %p926_p8 = pnand %p924_p6, %p1148_p13  ;;  %p933_p7 = por %p932_p5, %p931_p3 }
  0x4e   : > { %p927_p0 = pneg %p926_p8 }
  0x50   : > { %p934_p10 = pnand %p933_p7, %p927_p0 }
  0x52   : > { %937 = shalt.err (!%p934_p10)
}
  0x53   : > { %778 = dma.hbm_to_vmem [thread:$0]  (!%p1132_p11), %s1361_s4, 1024, %s204_s8, [#allocation9], %s1047_s15, %s1047_s15, %s1048_s16  }
  0x54   : > { %s1207_s14 = sadd.s32 1, %s1042_s21   ;;  %s30_s6 = sadd.s32 1, %s1038_s20 }
  0x55   : > { %s27_s17 = ssub.s32 %s1042_s21, %s1207_s14  ;;  %p37_p9 = scmp.ne.s32.totalorder %s1038_s20, %s1034_s19 }
  0x56   : > { %p28_p13 = scmp.eq.s32.totalorder %s27_s17, 0  ;;  %p38_p12 = scmp.eq.s32.totalorder %s1042_s21, 0 }
  0x57   : > { %p790_p2 = scmp.lt.s32.totalorder %s1042_s21, 2  ;;  %p1371_p4 = scmp.eq.s32.totalorder %s1104_s22, 1 }
  0x58   : > { %s1217_s23 = scalar_select %p28_p13, %s1038_s20, %s30_s6  }
  0x59   : > { %p39_p1 = por %p38_p12, %p37_p9  ;;  %p1221_p6 = por %p1371_p4, %p37_p9 }
  0x5a   : > { %s217_s29 = sand.u32 1, %s1038_s20   ;;  %s664_s7 = sshll.u32 %s1042_s21, 7 }
  0x5b   : > { %s663_s8 = sshll.u32 %s217_s29, 3  ;;  %s1230_s9 = scalar_lea.hbm %s1357_s0, %s664_s7 }
  0x5c   : > { %s221_s10 = scalar_lea.vmem [#allocation2], %s663_s8  ;;  %p1232_p11 = pnand %p790_p2, %p39_p1 }
  0x5d   : > { %s228_s11 = sshll.u32 %s221_s10, 4  ;;  %s218_s13 = scalar_lea.sflag [#allocation3], %s217_s29  ;;  %s1236_s11 = int_to_ptr.vmem [resolvable:$true] %s228_s11 }
  0x5e   : > { %s938_s30 = scalar_lea.hbm %s1230_s9, 128  ;;  %p940_p0 = pneg %p1232_p11 }
  0x5f   : > { %p939_p8 = scmp.ne.s32.totalorder %s1230_s9, %s938_s30  ;;  %s943_s6 = scalar_lea.hbm %s1357_s0, 256 }
  0x60   : > { %p944_p7 = scmp.lt.u32.totalorder %s1230_s9, %s1357_s0  ;;  %p945_p10 = scmp.lt.u32.totalorder %s943_s6, %s938_s30 }
  0x61   : > { %p941_p3 = pnand %p940_p0, %p939_p8  ;;  %p947_p9 = scmp.lt.u32.totalorder %s938_s30, %s1230_s9 }
  0x62   : > { %p946_p13 = por %p945_p10, %p944_p7 }
  0x63   : > { %p942_p5 = pneg %p941_p3 }
  0x64   : > { %p948_p12 = por %p947_p9, %p946_p13 }
  0x66   : > { %p949_p2 = pnand %p948_p12, %p942_p5 }
  0x68   : > { %952 = shalt.err (!%p949_p2)
}
  0x69   : > { %s953_s29 = scalar_lea.vmem %s1236_s11, 128  ;;  %s1049_s15 = smov [#allocation2]  }
  0x6a   : > { %p954_p1 = scmp.ne.s32.totalorder %s1236_s11, %s953_s29  ;;  %s958_s16 = sshll.u32 %s1049_s15, 4  ;;  %s959_s16 = int_to_ptr.vmem [resolvable:$false] %s958_s16 }
  0x6b   : > { %s960_s10 = scalar_lea.vmem %s959_s16, 256  ;;  %p961_p3 = scmp.lt.s32.totalorder %s1236_s11, %s959_s16 }
  0x6c   : > { %p956_p4 = pnand %p954_p1, %p940_p0  ;;  %p962_p7 = scmp.lt.s32.totalorder %s960_s10, %s953_s29 }
  0x6e   : > { %p957_p8 = pneg %p956_p4  ;;  %p963_p10 = por %p962_p7, %p961_p3 }
  0x70   : > { %p964_p13 = pnand %p963_p10, %p957_p8 }
  0x72   : > { %967 = shalt.err (!%p964_p13)
}
  0x73   : > { %782 = dma.hbm_to_vmem [thread:$0]  (!%p1232_p11), %s1230_s9, 128, %s1236_s11, %s218_s13  }
  0x74   : > { %p1374_p5 = scmp.ne.s32.totalorder %s1368_s26, 0 }
  0x75   : > { %s1266_s30 = sand.u32 (!%p1374_p5), 1, %s1034_s19   ;;  %p1375_p0 = scmp.ne.s32.totalorder (!%p1374_p5), %s1366_s24, 0 }
  0x76   : > { %237 = sbr.rel (%p1374_p5) target bundleno = 924 (0x39c), region = 40  ;;  %s666_s28 = sshll.u32 (!%p1374_p5), %s1266_s30, 3 }
  0x77   : > { %s240_s17 = scalar_lea.sflag (!%p1374_p5), [#allocation3], %s1266_s30  ;;  %s243_s6 = scalar_lea.vmem (!%p1374_p5), [#allocation2], %s666_s28 }
  0x7d   : > { %1013 = dma.done.wait (%p1375_p0), %s240_s17, 128  }
  0x7e   : > { %1015 = vsyncadd (%p1375_p0), %s240_s17, 4294967168  ;;  %p1376_p11 = scmp.eq.s32.totalorder %s1104_s22, 0 }
  0x80   : > { %1017 = dma.done.wait (%p1376_p11), [#allocation6], 1088   ;;  %p1377_p9 = pmov %p1376_p11 }
  0x82   : > { %1019 = vsyncadd (%p1377_p9), [#allocation6], 4294966208  ;;  %p1378_p12 = pmov %p1377_p9 }
  0x83   : > { %p1379_p2 = pmov %p1377_p9 }
  0x84   : > { %1021 = dma.done.wait (%p1378_p12), [#allocation9], 1024  }
  0x85   : > { %1023 = vsyncadd (%p1379_p2), [#allocation9], 4294966272  ;;  %v286_v0 = vlaneseq  ;;  %v283_v2 = vld [vmem:[%s243_s6] sm:$0xff]  ;;  %v834_v4 = vld [vmem:[#allocation7] sm:$0xff]   ;;  %v1050_v5 = vmov 0.0   ;;  %vm1051_vm1 = vmmov 0  }
  0x86   : > { %713 = vmatprep.subr.bf16.mxu0 %v1050_v5  ;;  %733 = vmatprep.subr.bf16.mxu1 %v1050_v5  ;;  %v835_v6 = vld [vmem:[#allocation7 + $0x8] sm:$0xff]   ;;  %v836_v12 = vld [vmem:[#allocation7 + $0x10] sm:$0xff]   ;;  %v837_v13 = vld [vmem:[#allocation7 + $0x18] sm:$0xff]   ;;  %s692_s9 = sshll.u32 %s1104_s22, 7  ;;  %s281_s11 = scalar_lea.vmem [#allocation10], %s666_s28 }
  0x87   : > { %v287_v1 = vand.u32 127, %v286_v0  ;;  %714 = vmatpush3.bf16.msra.mxu0 %v834_v4  ;;  %v838_v14 = vld [vmem:[#allocation7 + $0x20] sm:$0xff]   ;;  %729 = vmatprep.mubr.msk.bf16.mxu0 %vm1051_vm1, %v1050_v5  ;;  %v839_v15 = vld [vmem:[#allocation7 + $0x28] sm:$0xff]   ;;  %v840_v16 = vld [vmem:[#allocation7 + $0x30] sm:$0xff]   ;;  %s558_s12 = sshll.u32 %s281_s11, 4  ;;  %s1313_s8 = scalar_lea.hbm %s1362_s5, %s692_s9  ;;  %s1315_s12 = int_to_ptr.vmem [resolvable:$true] %s558_s12 }
  0x88   : > { %715 = vmatprep.subr.bf16.mxu0 %v1050_v5  ;;  %749 = vmatprep.mubr.msk.bf16.mxu1 %vm1051_vm1, %v1050_v5  ;;  %v841_v17 = vld [vmem:[#allocation7 + $0x38] sm:$0xff]   ;;  %v842_v28 = vld [vmem:[#allocation8] sm:$0xff]   ;;  %v843_v29 = vld [vmem:[#allocation8 + $0x8] sm:$0xff]   ;;  %s545_s22 = scalar_lea.sflag [#allocation4], %s1266_s30  ;;  %s968_s29 = scalar_lea.vmem %s1315_s12, 128 }
  0x89   : > { %vm288_vm0 = vcmp.lt.s32.totalorder %v287_v1, 32  ;;  %v671_v22 = vld [vmem:[#allocation5] ss:$0 sm:$0xff]  ;;  %v672_v24 = vld [vmem:[#allocation5 + $0x1] ss:$0 sm:$0xff]  ;;  %734 = vmatpush3.bf16.msra.mxu1 %v842_v28  ;;  %v844_v30 = vld [vmem:[#allocation8 + $0x10] sm:$0xff]   ;;  %p969_p1 = scmp.ne.s32.totalorder %s1315_s12, %s968_s29 }
  0x8a   : > { %v289_v3 = vsel %vm288_vm0, %v283_v2, 0.0  ;;  %735 = vmatprep.subr.bf16.mxu1 %v1050_v5  ;;  %v845_v31 = vld [vmem:[#allocation8 + $0x18] sm:$0xff]   ;;  %v846_v32 = vld [vmem:[#allocation8 + $0x20] sm:$0xff]   ;;  %v847_v33 = vld [vmem:[#allocation8 + $0x28] sm:$0xff]   ;;  %s1052_s15 = smov [#allocation10]  }
  0x8b   : > { %290 = vadd.xlane.f32.xlu0 %v289_v3  ;;  %716 = vmatpush3.bf16.msra.mxu0 %v835_v6  ;;  %v848_v34 = vld [vmem:[#allocation8 + $0x30] sm:$0xff]   ;;  %v849_v35 = vld [vmem:[#allocation8 + $0x38] sm:$0xff]   ;;  %v673_v36 = vld [vmem:[%s1359_s2] ss:$0 sm:$0xff]  ;;  %p970_p4 = pnand %p969_p1, %p1221_p6  ;;  %s972_s16 = sshll.u32 %s1052_s15, 4  ;;  %s973_s16 = int_to_ptr.vmem [resolvable:$false] %s972_s16 }
  0x8c   : > { %717 = vmatprep.subr.bf16.mxu0 %v1050_v5  ;;  %v682_v52 = vld [vmem:[#allocation5 + $0x2] ss:$0 sm:$0xff]  ;;  %s974_s10 = scalar_lea.vmem %s973_s16, 256  ;;  %p975_p3 = scmp.lt.s32.totalorder %s1315_s12, %s973_s16 }
  0x8d   : > { %736 = vmatpush3.bf16.msra.mxu1 %v843_v29  ;;  %p971_p8 = pneg %p970_p4  ;;  %p976_p7 = scmp.lt.s32.totalorder %s974_s10, %s968_s29 }
  0x8e   : > { %737 = vmatprep.subr.bf16.mxu1 %v1050_v5 }
  0x8f   : > { %718 = vmatpush3.bf16.msra.mxu0 %v836_v12  ;;  %p977_p10 = por %p976_p7, %p975_p3 }
  0x90   : > { %719 = vmatprep.subr.bf16.mxu0 %v1050_v5 }
  0x91   : > { %738 = vmatpush3.bf16.msra.mxu1 %v844_v30  ;;  %p978_p13 = pnand %p977_p10, %p971_p8 }
  0x92   : > { %739 = vmatprep.subr.bf16.mxu1 %v1050_v5 }
  0x93   : > { %720 = vmatpush3.bf16.msra.mxu0 %v837_v13 }
  0x94   : > { %721 = vmatprep.subr.bf16.mxu0 %v1050_v5 }
  0x95   : > { %740 = vmatpush3.bf16.msra.mxu1 %v845_v31 }
  0x96   : > { %741 = vmatprep.subr.bf16.mxu1 %v1050_v5 }
  0x97   : > { %722 = vmatpush3.bf16.msra.mxu0 %v838_v14 }
  0x98   : > { %723 = vmatprep.subr.bf16.mxu0 %v1050_v5 }
  0x99   : > { %742 = vmatpush3.bf16.msra.mxu1 %v846_v32 }
  0x9a   : > { %743 = vmatprep.subr.bf16.mxu1 %v1050_v5 }
  0x9b   : > { %724 = vmatpush3.bf16.msra.mxu0 %v839_v15 }
  0x9c   : > { %725 = vmatprep.subr.bf16.mxu0 %v1050_v5 }
  0x9d   : > { %744 = vmatpush3.bf16.msra.mxu1 %v847_v33 }
  0x9e   : > { %745 = vmatprep.subr.bf16.mxu1 %v1050_v5 }
  0x9f   : > { %726 = vmatpush3.bf16.msra.mxu0 %v840_v16 }
  0xa0   : > { %727 = vmatprep.subr.bf16.mxu0 %v1050_v5 }
  0xa1   : > { %746 = vmatpush3.bf16.msra.mxu1 %v848_v34 }
  0xa2   : > { %747 = vmatprep.subr.bf16.mxu1 %v1050_v5 }
  0xa3   : > { %728 = vmatpush3.bf16.msra.mxu0 %v841_v17 }
  0xa5   : > { %748 = vmatpush3.bf16.msra.mxu1 %v849_v35 }
 0x118   : > { %v291_v7 = vpop.xlane.xlu0 %290 }
 0x119   : > { %v292_v8 = vmul.f32 0.03125, %v291_v7 }
 0x11b   : > { %v293_v9 = vsub.f32 %v289_v3, %v292_v8 }
 0x11d   : > { %v294_v10 = vsel %vm288_vm0, %v293_v9, 0.0 }
 0x11e   : > { %v295_v11 = vmul.f32 %v294_v10, %v294_v10 }
 0x120   : > { %296 = vadd.xlane.f32.xlu0 %v295_v11 }
 0x1ad   : > { %v297_v18 = vpop.xlane.xlu0 %296 }
 0x1ae   : > { %v298_v19 = vmul.f32 0.03125, %v297_v18 }
 0x1b0   : > { %v299_v20 = vadd.f32 1e-05, %v298_v19 }
 0x1b2   : > { %850 = vrsqrt.f32 %v299_v20 }
 0x1bc   : > { %v851_v21 = vpop.eup %850 }
 0x1bd   : > { %v301_v23 = vmul.f32 %v851_v21, %v294_v10 }
 0x1bf   : > { %v306_v25 = vmul.f32 %v671_v22, %v301_v23 }
 0x1c1   : > { %v311_v26 = vadd.f32 %v672_v24, %v306_v25 }
 0x1c3   : > { %v312_v27 = vpack.c.bf16 %v311_v26, %v311_v26 }
 0x1c5   : > { %730 = vmatmul.mubr.bf16.vlgmr.msra.gmra.mrb[0].mxu0 %v312_v27 }
 0x298   : > { %v418_v37 = vpop.f32.mrb[0].mxu0 }
 0x299   : > { %v419_v38 = vadd.f32 %v673_v36, %v418_v37  ;;  %v731_v39 = vpop.f32.mrb[1].mxu0 }
 0x29a   : > { %v421_v40 = vpop.f32.mrb[2].mxu0 }
 0x29b   : > { %v424_v41 = vmul.f32 %v419_v38, %v419_v38  ;;  %v732_v42 = vpop.f32.mrb[3].mxu0 }
 0x29d   : > { %v425_v43 = vmul.f32 %v424_v41, %v419_v38 }
 0x29f   : > { %v426_v44 = vmul.f32 0.044715, %v425_v43 }
 0x2a1   : > { %v427_v45 = vadd.f32 %v426_v44, %v419_v38 }
 0x2a3   : > { %v428_v46 = vmul.f32 0.7978846, %v427_v45 }
 0x2a5   : > { %852 = vtanh.f32 %v428_v46 }
 0x2af   : > { %v853_v47 = vpop.eup %852 }
 0x2b0   : > { %v430_v48 = vadd.f32 1.0, %v853_v47 }
 0x2b2   : > { %v431_v49 = vmul.f32 0.5, %v430_v48 }
 0x2b4   : > { %v432_v50 = vmul.f32 %v431_v49, %v419_v38 }
 0x2b6   : > { %v433_v51 = vpack.c.bf16 %v432_v50, %v432_v50 }
 0x2b8   : > { %750 = vmatmul.mubr.bf16.vlgmr.msra.gmra.mrb[0].mxu1 %v433_v51 }
 0x38b   : > { %v537_v53 = vpop.f32.mrb[0].mxu1 }
 0x38c   : > { %v538_v54 = vadd.f32 %v682_v52, %v537_v53  ;;  %v751_v55 = vpop.f32.mrb[1].mxu1 }
 0x38d   : > { %v540_v56 = vpop.f32.mrb[2].mxu1 }
 0x38e   : > { %543 = vst [vmem:[%s281_s11] sm:$0xff] %v538_v54  ;;  %v752_v57 = vpop.f32.mrb[3].mxu1 }
 0x38f   : > { %981 = shalt.err (!%p978_p13)
}
 0x390   : > { %s982_s30 = scalar_lea.hbm %s1313_s8, 128  ;;  %s986_s6 = scalar_lea.hbm %s1362_s5, 256 }
 0x391   : > { %p983_p5 = scmp.ne.s32.totalorder %s1313_s8, %s982_s30  ;;  %p987_p9 = scmp.lt.u32.totalorder %s1313_s8, %s1362_s5 }
 0x392   : > { %p988_p12 = scmp.lt.u32.totalorder %s986_s6, %s982_s30  ;;  %p990_p1 = scmp.lt.u32.totalorder %s982_s30, %s1313_s8 }
 0x393   : > { %p984_p0 = pnand %p983_p5, %p1221_p6 }
 0x394   : > { %p989_p2 = por %p988_p12, %p987_p9 }
 0x395   : > { %p985_p11 = pneg %p984_p0 }
 0x396   : > { %p991_p4 = por %p990_p1, %p989_p2 }
 0x398   : > { %p992_p8 = pnand %p991_p4, %p985_p11 }
 0x39a   : > { %995 = shalt.err (!%p992_p8)
}
 0x39b   : > { %767 = dma.vmem_to_hbm [thread:$0]  (%p1221_p6), %s1315_s12, 128, %s1313_s8, %s545_s22  }
 0x39c PF: > { %s570_s9 = sand.u32 1, %s1030_s18   ;;  %p1380_p3 = scmp.ne.s32.totalorder %s1367_s25, 0 }
 0x39d   : > { %p1381_p7 = scmp.ge.s32.totalorder %s1042_s21, 2  ;;  %s571_s11 = scalar_lea.sflag [#allocation4], %s570_s9 }
 0x39f   : > { %p784_p10 = pnand %p1381_p7, %p1380_p3 }
 0x3a1   : > { %1025 = dma.done.wait (!%p784_p10), %s571_s11, 128  }
 0x3a2   : > { %1027 = vsyncadd (!%p784_p10), %s571_s11, 4294967168  ;;  %p20_p13 = scmp.ge.s32.totalorder %s1207_s14, 4   ;;  %s1382_s18 = smov %s1034_s19 }
 0x3a3   : > { %s1383_s19 = smov %s1038_s20  ;;  %s1384_s20 = smov %s1217_s23 }
 0x3a4   : > { %s1385_s21 = smov %s1207_s14  ;;  %22 = sbr.rel (!%p20_p13) target bundleno = 7 (0x7), region = 97 }
 0x3ab   :  { %576 = vsyncpa [#allocation3], 1 }
 0x3ac   :  { %578 = vsyncpa [#allocation3 + $0x1], 1 }
 0x3ad   :  { %579 = vsyncpa [#allocation6], 1 }
 0x3ae   :  { %580 = vsyncpa [#allocation9], 1 }
 0x3af   :  { %581 = vsyncpa [#allocation4], 1 }
 0x3b0   :  { %583 = vsyncpa [#allocation4 + $0x1], 1 }

</bundles_post_ra>
